<compile_context>
chip_gen: v7x
topology: tpu7x:2x2x1
jax: 0.10.0
libtpu: 0.0.40
codegen_flags: <defaults>
</compile_context>

<pallas_src>
import jax
import jax.numpy as jnp
import numpy as np
from jax.experimental import pallas as pl
from jax.experimental.pallas import tpu as pltpu


# ----------------------------------------------------------------------------
# Pallas kernel: pure MXU matmul (bias already folded into the weight matrix)
# ----------------------------------------------------------------------------
def _gabor_matmul_kernel(w_ref, p_ref, o_ref):
    """w_ref: (Cout, T1) bf16, p_ref: (T1, QB) bf16, o_ref: (Cout, QB) f32."""
    o_ref[...] = jnp.dot(w_ref[...], p_ref[...],
                         preferred_element_type=jnp.float32)


# ----------------------------------------------------------------------------
# Wrapper helpers
# ----------------------------------------------------------------------------
def _build_matmul_operands(x, w_oihw, bias):
    """im2col in XLA from static slices. Returns (Waug bf16, P bf16, Q)."""
    N, Cin, H, W = x.shape
    Cout, Cin_w, K, _ = w_oihw.shape
    assert Cin_w == Cin
    p = K // 2

    Q = N * H * W
    Qpad = ((Q + 255) // 256) * 256          # lane-dense (multiple of 256/128)

    # Zero 'same' padding, then 9 static tap slices -> patch matrix rows.
    xpad = jnp.pad(x, ((0, 0), (0, 0), (p, p), (p, p))).astype(jnp.bfloat16)
    taps = []
    for cin in range(Cin):
        for kh in range(K):
            for kw in range(K):
                taps.append(xpad[:, cin, kh:kh + H, kw:kw + W].reshape(1, Q))
    taps.append(jnp.ones((1, Q), jnp.bfloat16))          # bias row
    P = jnp.concatenate(taps, axis=0)                     # (T1, Q)
    P = jnp.pad(P, ((0, 0), (0, Qpad - Q)))               # (T1, Qpad)

    # Filters flattened in (cin, kh, kw) order; bias appended as last column.
    w_mat = w_oihw.reshape(Cout, Cin * K * K)
    w_aug = jnp.concatenate(
        [w_mat, bias.reshape(Cout, 1)], axis=1).astype(jnp.bfloat16)
    return w_aug, P, Q


def conv2d_same_bias(x, w_oihw, bias):
    """'same' conv + bias, NCHW in / NCHW out, one fused Pallas matmul."""
    N, Cin, H, W = x.shape
    Cout = w_oihw.shape[0]

    w_aug, P, Q = _build_matmul_operands(x, w_oihw, bias)
    T1, Qpad = P.shape

    # Split the lane axis into two blocks so v7x megacore keeps both TCs busy
    # (Qpad is always a multiple of 256, so each block stays 128-aligned).
    n_qblk = 2 if Qpad % 256 == 0 else 1
    QB = Qpad // n_qblk

    # TODO(synk): for large H, W (e.g. >=256) add more lane blocks and set
    # vmem_limit_bytes so the per-step output block fits v7x's 64 MiB VMEM.
    flops = 2 * Cout * T1 * Qpad
    bytes_accessed = (T1 * Qpad * 2            # P (bf16)
                      + n_qblk * Cout * T1 * 2  # Waug (bf16, re-read per block)
                      + Cout * Qpad * 4)        # output (f32)

    out_mat = pl.pallas_call(
        _gabor_matmul_kernel,
        out_shape=jax.ShapeDtypeStruct((Cout, Qpad), jnp.float32),
        grid_spec=pl.GridSpec(
            grid=(n_qblk,),
            in_specs=[
                pl.BlockSpec((Cout, T1), lambda q: (0, 0)),
                pl.BlockSpec((T1, QB), lambda q: (0, q)),
            ],
            out_specs=pl.BlockSpec((Cout, QB), lambda q: (0, q)),
        ),
        compiler_params=pltpu.CompilerParams(
            dimension_semantics=("parallel",)),
        cost_estimate=pl.CostEstimate(
            flops=flops, transcendentals=0, bytes_accessed=bytes_accessed),
    )(w_aug, P)

    # Flat column q = n*H*W + h*W + w ; drop lane tail padding and un-flatten.
    out = out_mat[:, :Q].reshape(Cout, N, H, W)
    return jnp.transpose(out, (1, 0, 2, 3))


def gabor_conv2d_forward(x, filt_cos, filt_sin, bias):
    """Matches GaborConv2d.forward: conv(cos)+b, conv(sin)+b, concat channels."""
    w = jnp.concatenate([filt_cos, filt_sin], axis=0)    # (2*half, Cin, K, K)
    b = jnp.concatenate([bias, bias], axis=0)            # (2*half,)
    return conv2d_same_bias(x, w, b)


# ----------------------------------------------------------------------------
# Deterministic Gabor filter-bank construction (host-side numpy, same formula)
# ----------------------------------------------------------------------------
def make_gabor_filters(key, in_channels, kernel_size, num_orientations, num_scales):
    # TODO(synk): parameters are sampled with JAX RNG using the same
    # distributions as torch.manual_seed(1) rand/randn; exact torch RNG
    # bit-reproduction is not available without torch.
    half = num_orientations * num_scales
    ks = jax.random.split(key, 6)
    sigma = np.asarray(jax.random.uniform(ks[0], (half,))) * 2.0 + 0.5
    theta = np.asarray(jax.random.uniform(ks[1], (half,))) * np.pi
    lam   = np.asarray(jax.random.uniform(ks[2], (half,))) * 3.0 + 1.0
    psi   = np.asarray(jax.random.uniform(ks[3], (half,))) * 2.0 * np.pi
    gamma = np.asarray(jax.random.uniform(ks[4], (half,))) * 2.0 + 0.5
    bias  = np.asarray(jax.random.normal(ks[5], (half,))).astype(np.float32)

    n = kernel_size // 2
    y, x = np.mgrid[-n:n + 1, -n:n + 1]
    y = y.astype(np.float64)
    x = x.astype(np.float64)

    f_cos = np.zeros((half, in_channels, kernel_size, kernel_size), np.float32)
    f_sin = np.zeros_like(f_cos)
    for i in range(num_orientations):
        for j in range(num_scales):
            idx = i * num_scales + j
            s = sigma[idx] * (2.1 ** j)
            th = theta[idx] + i * 2.0 * np.pi / num_orientations
            x_th = x * np.cos(th) + y * np.sin(th)
            y_th = -x * np.sin(th) + y * np.cos(th)
            env = np.exp(-0.5 * (x_th ** 2 / s ** 2
                                 + y_th ** 2 / s ** 2 / gamma[idx] ** 2))
            f_cos[idx, :] = (env * np.cos(2.0 * np.pi / lam[idx] * x_th + psi[idx]))[None]
            f_sin[idx, :] = (env * np.sin(2.0 * np.pi / lam[idx] * x_th + psi[idx]))[None]
    return jnp.asarray(f_cos), jnp.asarray(f_sin), jnp.asarray(bias)


# ----------------------------------------------------------------------------
# Pure-JAX reference (mirrors the PyTorch forward exactly, f32 HIGHEST)
# ----------------------------------------------------------------------------
def reference_forward(x, filt_cos, filt_sin, bias):
    K = filt_cos.shape[-1]
    p = K // 2
    dn = ('NCHW', 'OIHW', 'NCHW')

    def conv(w):
        return jax.lax.conv_general_dilated(
            x, w, window_strides=(1, 1), padding=[(p, p), (p, p)],
            dimension_numbers=dn, precision=jax.lax.Precision.HIGHEST)

    b = bias[None, :, None, None]
    return jnp.concatenate([conv(filt_cos) + b, conv(filt_sin) + b], axis=1)


# ----------------------------------------------------------------------------
# Main
# ----------------------------------------------------------------------------
if __name__ == "__main__":
    key = jax.random.PRNGKey(0)
    kp, kx = jax.random.split(key)

    in_channels, kernel_size = 1, 3
    num_orientations, num_scales = 8, 5
    N, H, W = 2, 16, 16
    Cout = 2 * num_orientations * num_scales        # 80

    f_cos, f_sin, bias = make_gabor_filters(
        kp, in_channels, kernel_size, num_orientations, num_scales)
    x = jax.random.normal(kx, (N, in_channels, H, W), dtype=jnp.float32)

    fwd = jax.jit(gabor_conv2d_forward)
    out = jax.block_until_ready(fwd(x, f_cos, f_sin, bias))

    assert out.shape == (N, Cout, H, W), out.shape
    assert bool(jnp.all(jnp.isfinite(out)))

    # (1) Kernel exactness: compare against an XLA matmul on the *same* bf16
    # operands (bf16 products are exact in f32, only accumulation order can
    # differ), isolating the Pallas/MXU path from dtype-cast error.
    w_all = jnp.concatenate([f_cos, f_sin], axis=0)
    b_all = jnp.concatenate([bias, bias], axis=0)
    w_aug, P, Q = _build_matmul_operands(x, w_all, b_all)
    exact = jnp.dot(w_aug.astype(jnp.float32), P.astype(jnp.float32),
                    precision=jax.lax.Precision.HIGHEST)
    exact = jnp.transpose(exact[:, :Q].reshape(Cout, N, H, W), (1, 0, 2, 3))
    exact_err = float(jnp.max(jnp.abs(out - exact)))
    assert exact_err < 1e-4, f"kernel vs same-operand matmul: {exact_err}"

    # (2) End-to-end vs f32 HIGHEST conv reference; the residual is bf16
    # operand quantization over a 9-tap contraction (|w|<=1, |x|<~4).
    ref = reference_forward(x, f_cos, f_sin, bias)
    max_err = float(jnp.max(jnp.abs(out - ref)))
    assert max_err < 5e-2, f"max abs err vs f32 reference: {max_err}"

    print("KERNEL_OK")
</pallas_src>

<mosaic_0001>
module attributes {stable_mosaic.version = 11 : i64} {
  func.func @_gabor_matmul_kernel(%arg0: i32, %arg1: memref<80x10xbf16, #tpu.memory_space<vmem>>, %arg2: memref<10x256xbf16, #tpu.memory_space<vmem>>, %arg3: memref<80x256xf32, #tpu.memory_space<vmem>>) attributes {dimension_semantics = [#tpu.dimension_semantics<parallel>], iteration_bounds = array<i64: 2>, scalar_prefetch = 0 : i64, scratch_operands = 0 : i64, tpu.core_type = #tpu.core_type<tc>, window_params = [{pipeline_mode = #tpu.pipeline_mode<synchronous>, transform_indices = @transform_0, window_bounds = array<i64: 80, 10>}, {transform_indices = @transform_1, window_bounds = array<i64: 10, 256>}, {transform_indices = @transform_2, window_bounds = array<i64: 80, 256>}]} {
    %c0 = arith.constant 0 : index
    %c0_0 = arith.constant 0 : index
    %0 = vector.load %arg1[%c0, %c0_0] : memref<80x10xbf16, #tpu.memory_space<vmem>>, vector<80x10xbf16>
    %c0_1 = arith.constant 0 : index
    %c0_2 = arith.constant 0 : index
    %1 = vector.load %arg2[%c0_1, %c0_2] : memref<10x256xbf16, #tpu.memory_space<vmem>>, vector<10x256xbf16>
    %cst = arith.constant dense<0.000000e+00> : vector<80x256xf32>
    %2 = tpu.matmul %0, %1, %cst {dimension_numbers = #tpu.dot_dimension_numbers<[1], [0], [0], [1], [0, 0, 1, 1], [], []>} : vector<80x10xbf16>, vector<10x256xbf16>, vector<80x256xf32> -> vector<80x256xf32>
    %c0_3 = arith.constant 0 : index
    %c0_4 = arith.constant 0 : index
    %3 = vector.load %arg3[%c0_3, %c0_4] : memref<80x256xf32, #tpu.memory_space<vmem>>, vector<80x256xf32>
    tpu.vector_store %arg3[%c0_3, %c0_4], %2 {strides = array<i32>} : memref<80x256xf32, #tpu.memory_space<vmem>>, vector<80x256xf32>,
    return
  }
  func.func @transform_0(%arg0: i32) -> (i32, i32) {
    %c0_i32 = arith.constant 0 : i32
    %c0_i32_0 = arith.constant 0 : i32
    %c0_i32_1 = arith.constant 0 : i32
    return %c0_i32, %c0_i32_0 : i32, i32
  }
  func.func @transform_1(%arg0: i32) -> (i32, i32) {
    %c0_i32 = arith.constant 0 : i32
    %c0_i32_0 = arith.constant 0 : i32
    return %c0_i32, %arg0 : i32, i32
  }
  func.func @transform_2(%arg0: i32) -> (i32, i32) {
    %c0_i32 = arith.constant 0 : i32
    %c0_i32_0 = arith.constant 0 : i32
    return %c0_i32, %arg0 : i32, i32
  }
}

</mosaic_0001>

<bundles_post_ra>
// kernel: squeeze.13
= control target key start
LH: loop header
LB: loop body
LE: loop exit
PB: predicated region body
PF: predicated region fallthrough
CT: control target
= control target key end

     0   :  { %s166_s10 = smov 80   ;;  %vm66_vm0 = vcmask 130048   ;;  %s167_s11 = smov 96   ;;  %vm72_vm1 = vcmask 1048448   ;;  %vm78_vm2 = vcmask 917248   ;;  %vm84_vm3 = vcmask 786048   ;;  %s201_s0 = inlined_call_operand.vmem [shape: bf16[2,1,16,16], index: 0, kind: input, shape index: {}]   ;;  %s202_s1 = inlined_call_operand.vmem [shape: bf16[1,512], index: 1, kind: output, shape index: {}]  }
   0x1   :  { %v156_v0 = vld [vmem:[%s201_s0 + $0x8] sm:$0xff]   ;;  %v153_v1 = vld [vmem:[%s201_s0] sm:$0xff]   ;;  %s165_s0 = smov 112   ;;  %s168_s12 = smov 64   ;;  %vm90_vm4 = vcmask 654848   ;;  %vm96_vm5 = vcmask 523648  }
   0x2   :  { %v150_v2 = vunpack.c.l.bf16 %v156_v0  ;;  %v151_v3 = vunpack.c.h.bf16 %v156_v0  ;;  %v154_v4 = vunpack.c.l.bf16 %v153_v1  ;;  %v155_v5 = vunpack.c.h.bf16 %v153_v1  ;;  %s169_s13 = smov 48   ;;  %s170_s14 = smov 32  }
   0x3   :  { %s171_s15 = smov 16   ;;  %vm102_vm6 = vcmask 392448   ;;  %vm108_vm7 = vcmask 261248   ;;  %v172_v24 = vmov 0.0  }
   0x4   :  { %20 = vst [vmem:[#allocation1 + $0x18] sm:$0xff] %v151_v3  ;;  %36 = vst [vmem:[#allocation1 + $0x10] sm:$0xff] %v150_v2 }
   0x5   :  { %51 = vst [vmem:[#allocation1 + $0x8] sm:$0xff] %v155_v5  ;;  %64 = vst [vmem:[#allocation1] sm:$0xff] %v154_v4 }
   0xc   :  { %v69_v6 = vld [vmem:[#allocation1 + $0x7] ss:$8 sm:$0xf]   ;;  %v81_v7 = vld [vmem:[#allocation1 + $0x5] ss:$8 sm:$0xf]  }
   0xd   :  { %70 = vrot.lane.b32.xlu0 %v69_v6, %s165_s0  ;;  %82 = vrot.lane.b32.xlu1 %v81_v7, %s166_s10  ;;  %v75_v8 = vld [vmem:[#allocation1 + $0x6] ss:$8 sm:$0xf]   ;;  %v87_v9 = vld [vmem:[#allocation1 + $0x4] ss:$8 sm:$0xf]  }
   0xe   :  { %v65_v10 = vld [vmem:[#allocation1] ss:$8 sm:$0xf]   ;;  %v93_v11 = vld [vmem:[#allocation1 + $0x3] ss:$8 sm:$0xf]  }
   0xf   :  { %67 = vst.msk [vmem:[#allocation0] ss:$8 sm:$0xf] %vm66_vm0, %v65_v10   ;;  %v99_v12 = vld [vmem:[#allocation1 + $0x2] ss:$8 sm:$0xf]  }
  0x10   :  { %v105_v13 = vld [vmem:[#allocation1 + $0x1] ss:$8 sm:$0xf]  }
  0x11   :  { %76 = vrot.lane.b32.xlu0 %v75_v8, %s167_s11  ;;  %88 = vrot.lane.b32.xlu1 %v87_v9, %s168_s12 }
  0x15   :  { %94 = vrot.lane.b32.xlu0 %v93_v11, %s169_s13  ;;  %100 = vrot.lane.b32.xlu1 %v99_v12, %s170_s14 }
  0x19   :  { %106 = vrot.lane.b32.xlu0 %v105_v13, %s171_s15 }
  0x7f   :  { %v71_v14 = vpop.permute.xlu0 %70   ;;  %v83_v15 = vpop.permute.xlu1 %82  }
  0x80   :  { %73 = vst.msk [vmem:[#allocation0] ss:$8 sm:$0xf] %vm72_vm1, %v71_v14  }
  0x83   :  { %v77_v16 = vpop.permute.xlu0 %76   ;;  %v89_v17 = vpop.permute.xlu1 %88  }
  0x84   :  { %79 = vst.msk [vmem:[#allocation0] ss:$8 sm:$0xf] %vm78_vm2, %v77_v16  }
  0x85   :  { %85 = vst.msk [vmem:[#allocation0] ss:$8 sm:$0xf] %vm84_vm3, %v83_v15  }
  0x86   :  { %91 = vst.msk [vmem:[#allocation0] ss:$8 sm:$0xf] %vm90_vm4, %v89_v17  }
  0x87   :  { %v95_v18 = vpop.permute.xlu0 %94   ;;  %v101_v19 = vpop.permute.xlu1 %100  }
  0x88   :  { %97 = vst.msk [vmem:[#allocation0] ss:$8 sm:$0xf] %vm96_vm5, %v95_v18  }
  0x89   :  { %103 = vst.msk [vmem:[#allocation0] ss:$8 sm:$0xf] %vm102_vm6, %v101_v19  }
  0x8b   :  { %v107_v20 = vpop.permute.xlu0 %106  }
  0x8c   :  { %109 = vst.msk [vmem:[#allocation0] ss:$8 sm:$0xf] %vm108_vm7, %v107_v20  }
  0x93   :  { %v114_v21 = vld [vmem:[#allocation0] sm:$0x3]  ;;  %v119_v22 = vld [vmem:[#allocation0 + $0x8] sm:$0x3]  ;;  %v125_v23 = vld [vmem:[#allocation0 + $0x10] sm:$0x3] }
  0x94   :  { %v115_v25 = vpack.c.bf16 %v172_v24, %v114_v21  ;;  %v120_v26 = vpack.c.bf16 %v172_v24, %v119_v22  ;;  %v126_v27 = vpack.c.bf16 %v172_v24, %v125_v23  ;;  %v132_v28 = vld [vmem:[#allocation0 + $0x18] sm:$0x3] }
  0x95   :  { %v133_v29 = vpack.c.bf16 %v172_v24, %v132_v28 }
  0x96   :  { %117 = vst [vmem:[%s202_s1] sm:$0x1] %v115_v25  ;;  %145 = vst [vmem:[%s202_s1 + $0x1] sm:$0x1] %v120_v26 }
  0x97   :  { %146 = vst [vmem:[%s202_s1 + $0x2] sm:$0x1] %v126_v27  ;;  %147 = vst [vmem:[%s202_s1 + $0x3] sm:$0x1] %v133_v29 }

// kernel: gabor_conv2d_forward.1
= control target key start
LH: loop header
LB: loop body
LE: loop exit
PB: predicated region body
PF: predicated region fallthrough
CT: control target
= control target key end

     0   :  { %s576_s9 = smov 0   ;;  %s578_s10 = smov 0   ;;  %s715_s0 = inlined_call_operand.vmem [shape: bf16[80,10], index: 0, kind: input, shape index: {}]   ;;  %s716_s1 = inlined_call_operand.vmem [shape: bf16[10,512], index: 1, kind: input, shape index: {}]   ;;  %s717_s2 = inlined_call_operand.vmem [shape: f32[80,512], index: 2, kind: output, shape index: {}]  }
   0x1   :  { %s580_s11 = smov 0  }
   0x2 LB: > { %s472_s12 = sadd.s32 4294967295, %s558_s11   ;;  %s593_s13 = sadd.s32 1, %s558_s11   ;;  %s558_s11 = sphi %s580_s11, %s721_s11   ;;  %s554_s10 = sphi %s578_s10, %s720_s10   ;;  %s550_s9 = sphi %s576_s9, %s719_s9  }
   0x3   : > { %s37_s14 = ssub.s32 %s558_s11, %s593_s13  ;;  %s40_s15 = sadd.s32 1, %s554_s10 }
   0x4   : > { %p38_p0 = scmp.eq.s32.totalorder %s37_s14, 0  ;;  %p47_p1 = scmp.ne.s32.totalorder %s554_s10, %s550_s9 }
   0x5   : > { %p48_p2 = scmp.eq.s32.totalorder %s558_s11, 0  ;;  %p77_p3 = scmp.eq.s32.totalorder %s472_s12, 1 }
   0x6   : > { %s604_s16 = scalar_select %p38_p0, %s554_s10, %s40_s15  }
   0x7   : > { %p49_p4 = por %p48_p2, %p47_p1  ;;  %p606_p5 = por %p77_p3, %p47_p1 }
   0x8   : > { %p475_p6 = scmp.ge.s32.totalorder %s558_s11, 2 }
   0xa   : > { %102 = sbr.rel (%p475_p6) target bundleno = 24 (0x18), region = 20 }
  0x11   : > { %105 = sbr.rel (!%p49_p4) target bundleno = 24 (0x18), region = 24  ;;  %s107_s18 = sand.u32 (%p49_p4), 1, %s554_s10  }
  0x12   : > { %s498_s19 = sshll.u32 (%p49_p4), %s558_s11, 3  ;;  %s476_s20 = sshll.u32 (%p49_p4), %s107_s18, 4 }
  0x13   : > { %s112_s23 = scalar_lea.vmem (%p49_p4), %s716_s1, %s498_s19  ;;  %s109_s24 = scalar_lea.vmem (%p49_p4), [#allocation2], %s476_s20 }
  0x14   : > { %v142_v0 = vld [vmem:[%s112_s23] sm:$0xff] (%p49_p4)  ;;  %v144_v1 = vld [vmem:[%s112_s23 + $0x10] sm:$0xff] (%p49_p4) }
  0x15   : > { %143 = vst [vmem:[%s109_s24] sm:$0xff] (%p49_p4), %v142_v0  ;;  %145 = vst [vmem:[%s109_s24 + $0x8] sm:$0xff] (%p49_p4), %v144_v1 }
  0x18 PF: > { %p479_p7 = scmp.ge.s32.totalorder %s558_s11, 1  ;;  %p150_p8 = scmp.lt.s32.totalorder %s558_s11, 3 }
  0x1a   : > { %p151_p9 = pnand %p479_p7, %p150_p8 }
  0x1b   : > { %s157_s25 = sand.u32 (!%p151_p9), 1, %s550_s9   ;;  %v560_v2 = vmov (!%p151_p9), 0   ;;  %vm241_vm0 = vcmask (!%p151_p9), 1044480   ;;  %v531_v5 = vld [vmem:[%s715_s0] sm:$0xff] (!%p151_p9)   ;;  %v532_v7 = vld [vmem:[%s715_s0 + $0x18] sm:$0xff] (!%p151_p9)   ;;  %vm225_vm1 = vcmask (!%p151_p9), 80896  }
  0x1c   : > { %154 = sbr.rel (%p151_p9) target bundleno = 275 (0x113), region = 62  ;;  %s480_s26 = sshll.u32 (!%p151_p9), %s157_s25, 4  ;;  %280 = vmatprep.mubr.bf16.mxu0 (!%p151_p9), %v560_v2  ;;  %310 = vmatprep.mubr.bf16.mxu1 (!%p151_p9), %v560_v2  ;;  %v533_v8 = vld [vmem:[%s715_s0 + $0x8] sm:$0xff] (!%p151_p9)   ;;  %v534_v9 = vld [vmem:[%s715_s0 + $0x20] sm:$0xff] (!%p151_p9)   ;;  %v535_v10 = vld [vmem:[%s715_s0 + $0x10] sm:$0xff] (!%p151_p9)  }
  0x1d   : > { %s159_s27 = scalar_lea.vmem (!%p151_p9), [#allocation2], %s480_s26  ;;  %s502_s14 = smul.u32 (!%p151_p9), 160, %s157_s25 }
  0x1e   : > { %v528_v3 = vld [vmem:[%s159_s27 + $0x4] ss:$8 sps:$4 sm:$0x1f] (!%p151_p9)   ;;  %v530_v4 = vld [vmem:[%s159_s27] ss:$8 sps:$4 sm:$0x1f] (!%p151_p9)  }
  0x1f   : > { %488 = vmatprep.subr.msk.bf16.mxu0 (!%p151_p9), %vm241_vm0, %v528_v3  ;;  %v243_v6 = vsel (!%p151_p9), %vm241_vm0, %v530_v4, 0  ;;  %500 = vmatprep.subr.msk.bf16.mxu1 (!%p151_p9), %vm241_vm0, %v528_v3  ;;  %s634_s15 = scalar_lea.vmem (!%p151_p9), [#allocation3], %s502_s14 }
  0x20   : > { %249 = vmatpush1.bf16.msra.mxu0 (!%p151_p9), %v243_v6  ;;  %501 = vmatpush1.bf16.msra.mxu1 (!%p151_p9), %v243_v6 }
  0x23   : > { %489 = vmatmul.mubr.msk.bf16.vlgmr.msra.gmra.mrb[0].mxu0 %vm225_vm1, %v531_v5  ;;  %492 = vmatmul.mubr.msk.bf16.vlgmr.msra.gmra.mrb[0].mxu1 %vm225_vm1, %v532_v7  ;;  %s499_s18 = sshll.u32 (%p606_p5), %s472_s12, 4 }
  0x24   : > { %290 = vmatprep.mubr.bf16.mxu0 %v560_v2  ;;  %320 = vmatprep.mubr.bf16.mxu1 %v560_v2  ;;  %s666_s17 = scalar_lea.vmem (%p606_p5), %s717_s2, %s499_s18 }
  0x2b   : > { %490 = vmatmul.mubr.msk.bf16.gmra.mrb[4].mxu0 %vm225_vm1, %v533_v8  ;;  %493 = vmatmul.mubr.msk.bf16.gmra.mrb[4].mxu1 %vm225_vm1, %v534_v9 }
  0x2c   : > { %300 = vmatprep.mubr.bf16.mxu0 %v560_v2 }
  0x33   : > { %491 = vmatmul.mubr.msk.bf16.gmra.mrb[8].mxu0 %vm225_vm1, %v535_v10 }
  0xf6   : > { %v282_v11 = vpop.f32.mrb[0].mxu0  ;;  %v312_v12 = vpop.f32.mrb[0].mxu1 }
  0xf7   : > { %331 = vst [vmem:[%s634_s15] sm:$0xff] %v282_v11  ;;  %v284_v13 = vpop.f32.mrb[1].mxu0  ;;  %343 = vst [vmem:[%s634_s15 + $0x60] sm:$0xff] %v312_v12  ;;  %v314_v14 = vpop.f32.mrb[1].mxu1 }
  0xf8   : > { %332 = vst [vmem:[%s634_s15 + $0x8] sm:$0xff] %v284_v13  ;;  %v286_v15 = vpop.f32.mrb[2].mxu0  ;;  %344 = vst [vmem:[%s634_s15 + $0x68] sm:$0xff] %v314_v14  ;;  %v316_v16 = vpop.f32.mrb[2].mxu1 }
  0xf9   : > { %333 = vst [vmem:[%s634_s15 + $0x10] sm:$0xff] %v286_v15  ;;  %v288_v17 = vpop.f32.mrb[3].mxu0  ;;  %345 = vst [vmem:[%s634_s15 + $0x70] sm:$0xff] %v316_v16  ;;  %v318_v18 = vpop.f32.mrb[3].mxu1 }
  0xfa   : > { %334 = vst [vmem:[%s634_s15 + $0x18] sm:$0xff] %v288_v17  ;;  %346 = vst [vmem:[%s634_s15 + $0x78] sm:$0xff] %v318_v18 }
  0xfe   : > { %v292_v19 = vpop.f32.mrb[4].mxu0  ;;  %v322_v20 = vpop.f32.mrb[4].mxu1  ;;  %v373_v31 = vld [vmem:[%s634_s15] sm:$0xff] (%p606_p5) }
  0xff   : > { %335 = vst [vmem:[%s634_s15 + $0x20] sm:$0xff] %v292_v19  ;;  %v294_v21 = vpop.f32.mrb[5].mxu0  ;;  %347 = vst [vmem:[%s634_s15 + $0x80] sm:$0xff] %v322_v20  ;;  %v324_v22 = vpop.f32.mrb[5].mxu1  ;;  %v375_v32 = vld [vmem:[%s634_s15 + $0x8] sm:$0xff] (%p606_p5)  ;;  %v397_v43 = vld [vmem:[%s634_s15 + $0x60] sm:$0xff] (%p606_p5) }
 0x100   : > { %336 = vst [vmem:[%s634_s15 + $0x28] sm:$0xff] %v294_v21  ;;  %v296_v23 = vpop.f32.mrb[6].mxu0  ;;  %348 = vst [vmem:[%s634_s15 + $0x88] sm:$0xff] %v324_v22  ;;  %v326_v24 = vpop.f32.mrb[6].mxu1  ;;  %v377_v33 = vld [vmem:[%s634_s15 + $0x10] sm:$0xff] (%p606_p5)  ;;  %v399_v44 = vld [vmem:[%s634_s15 + $0x68] sm:$0xff] (%p606_p5) }
 0x101   : > { %337 = vst [vmem:[%s634_s15 + $0x30] sm:$0xff] %v296_v23  ;;  %v298_v25 = vpop.f32.mrb[7].mxu0  ;;  %349 = vst [vmem:[%s634_s15 + $0x90] sm:$0xff] %v326_v24  ;;  %v328_v26 = vpop.f32.mrb[7].mxu1  ;;  %v379_v34 = vld [vmem:[%s634_s15 + $0x18] sm:$0xff] (%p606_p5)  ;;  %v401_v45 = vld [vmem:[%s634_s15 + $0x70] sm:$0xff] (%p606_p5) }
 0x102   : > { %338 = vst [vmem:[%s634_s15 + $0x38] sm:$0xff] %v298_v25  ;;  %350 = vst [vmem:[%s634_s15 + $0x98] sm:$0xff] %v328_v26  ;;  %v403_v46 = vld [vmem:[%s634_s15 + $0x78] sm:$0xff] (%p606_p5) }
 0x103   : > { %374 = vst [vmem:[%s666_s17] sm:$0xff] (%p606_p5), %v373_v31  ;;  %376 = vst [vmem:[%s666_s17 + $0x8] sm:$0xff] (%p606_p5), %v375_v32 }
 0x104   : > { %357 = sbr.rel (!%p606_p5) target bundleno = 275 (0x113), region = 70  ;;  %378 = vst [vmem:[%s666_s17 + $0x20] sm:$0xff] (%p606_p5), %v377_v33  ;;  %380 = vst [vmem:[%s666_s17 + $0x28] sm:$0xff] (%p606_p5), %v379_v34 }
 0x105   : > { %398 = vst [vmem:[%s666_s17 + $0xc0] sm:$0xff] (%p606_p5), %v397_v43  ;;  %400 = vst [vmem:[%s666_s17 + $0xc8] sm:$0xff] (%p606_p5), %v399_v44 }
 0x106   : > { %v302_v27 = vpop.f32.mrb[8].mxu0  ;;  %v381_v35 = vld [vmem:[%s634_s15 + $0x20] sm:$0xff] (%p606_p5)  ;;  %402 = vst [vmem:[%s666_s17 + $0xe0] sm:$0xff] (%p606_p5), %v401_v45  ;;  %404 = vst [vmem:[%s666_s17 + $0xe8] sm:$0xff] (%p606_p5), %v403_v46 }
 0x107   : > { %339 = vst [vmem:[%s634_s15 + $0x40] sm:$0xff] %v302_v27  ;;  %v304_v28 = vpop.f32.mrb[9].mxu0  ;;  %v383_v36 = vld [vmem:[%s634_s15 + $0x28] sm:$0xff] (%p606_p5)  ;;  %382 = vst [vmem:[%s666_s17 + $0x40] sm:$0xff] (%p606_p5), %v381_v35  ;;  %v405_v47 = vld [vmem:[%s634_s15 + $0x80] sm:$0xff] (%p606_p5) }
 0x108   : > { %340 = vst [vmem:[%s634_s15 + $0x48] sm:$0xff] %v304_v28  ;;  %v306_v29 = vpop.f32.mrb[10].mxu0  ;;  %384 = vst [vmem:[%s666_s17 + $0x48] sm:$0xff] (%p606_p5), %v383_v36  ;;  %v385_v37 = vld [vmem:[%s634_s15 + $0x30] sm:$0xff] (%p606_p5)  ;;  %v407_v48 = vld [vmem:[%s634_s15 + $0x88] sm:$0xff] (%p606_p5) }
 0x109   : > { %341 = vst [vmem:[%s634_s15 + $0x50] sm:$0xff] %v306_v29  ;;  %v308_v30 = vpop.f32.mrb[11].mxu0  ;;  %v387_v38 = vld [vmem:[%s634_s15 + $0x38] sm:$0xff] (%p606_p5)  ;;  %386 = vst [vmem:[%s666_s17 + $0x60] sm:$0xff] (%p606_p5), %v385_v37  ;;  %v409_v49 = vld [vmem:[%s634_s15 + $0x90] sm:$0xff] (%p606_p5) }
 0x10a   : > { %342 = vst [vmem:[%s634_s15 + $0x58] sm:$0xff] %v308_v30  ;;  %388 = vst [vmem:[%s666_s17 + $0x68] sm:$0xff] (%p606_p5), %v387_v38  ;;  %v411_v50 = vld [vmem:[%s634_s15 + $0x98] sm:$0xff] (%p606_p5) }
 0x10b   : > { %406 = vst [vmem:[%s666_s17 + $0x100] sm:$0xff] %v405_v47  ;;  %408 = vst [vmem:[%s666_s17 + $0x108] sm:$0xff] %v407_v48 }
 0x10c   : > { %410 = vst [vmem:[%s666_s17 + $0x120] sm:$0xff] %v409_v49  ;;  %412 = vst [vmem:[%s666_s17 + $0x128] sm:$0xff] %v411_v50 }
 0x10e   : > { %v389_v39 = vld [vmem:[%s634_s15 + $0x40] sm:$0xff] }
 0x10f   : > { %390 = vst [vmem:[%s666_s17 + $0x80] sm:$0xff] %v389_v39  ;;  %v391_v40 = vld [vmem:[%s634_s15 + $0x48] sm:$0xff] }
 0x110   : > { %v393_v41 = vld [vmem:[%s634_s15 + $0x50] sm:$0xff]  ;;  %392 = vst [vmem:[%s666_s17 + $0x88] sm:$0xff] %v391_v40 }
 0x111   : > { %v395_v42 = vld [vmem:[%s634_s15 + $0x58] sm:$0xff]  ;;  %394 = vst [vmem:[%s666_s17 + $0xa0] sm:$0xff] %v393_v41 }
 0x112   : > { %396 = vst [vmem:[%s666_s17 + $0xa8] sm:$0xff] %v395_v42 }
 0x113 PF: > { %p9_p10 = scmp.ge.s32.totalorder %s593_s13, 4   ;;  %s719_s9 = smov %s554_s10 }
 0x114   : > { %s720_s10 = smov %s604_s16  ;;  %s721_s11 = smov %s593_s13 }
 0x115   :  { %11 = sbr.rel (!%p9_p10) target bundleno = 2 (0x2), region = 124 }

</bundles_post_ra>
